<compile_context>
chip_gen: v5e
topology: v5e:2x2
jax: 0.10.0
libtpu: 0.0.40
codegen_flags: <defaults>
</compile_context>

<pallas_src>
import functools

import jax
import jax.numpy as jnp
from jax.experimental import pallas as pl
from jax.experimental.pallas import tpu as pltpu

EPS = 1e-3
MAX_DEV = 5.0
LEAKY_SLOPE = 0.01  # torch default for nn.LeakyReLU
LANES = 128


def _leaky_relu(x):
    return jnp.where(x >= 0.0, x, LEAKY_SLOPE * x)


def _softclamp(x, low, high):
    # smooth clamp of x into (low, high); ~identity in the interior
    x = low + jax.nn.softplus(x - low)
    x = high - jax.nn.softplus(high - x)
    return x


# ---------------------------------------------------------------------------
# Kernel
# ---------------------------------------------------------------------------
def _cggmm_kernel(x_ref, w_ref, b_ref, out_ref, *, d_in, hidden, mo, m):
    H, MO, M = hidden, mo, m
    x = x_ref[...]

    # packed weight blob: rows [0:d_in]=W1, [d_in:d_in+128]=W2, [d_in+128:d_in+256]=W3
    w1 = w_ref[0:d_in, :]
    w2 = w_ref[d_in:d_in + LANES, :]
    w3 = w_ref[d_in + LANES:d_in + 2 * LANES, :]
    # packed bias blob: row0=b1, row1=b2, row2=b3, row3=softclamped constant_scale_diag
    b1 = b_ref[0:1, :]
    b2 = b_ref[1:2, :]
    b3 = b_ref[2:3, :]
    csd = b_ref[3:4, 0:MO]                       # softclamp hoisted to the wrapper

    # --- fused x-side GEMM: [feature-l0 | gate-l0 | linear_loc] -------------
    a1 = jnp.dot(x, w1, preferred_element_type=jnp.float32) + b1       # (T, 128)
    a1_act = _leaky_relu(a1)
    lin_loc = _softclamp(a1[:, 2 * H:2 * H + MO], -MAX_DEV, MAX_DEV)

    # --- fused second GEMM (block-diag W2): [feature-l1 | gate-l1] ----------
    # rows of w2 beyond 2H are zero, so feeding the full activated a1 is exact.
    a2 = jnp.dot(a1_act, w2, preferred_element_type=jnp.float32) + b2  # (T, 128)
    a2_act = _leaky_relu(a2)                     # feature h lives in cols 0:H
    gates = jax.nn.sigmoid(a2[:, H:H + MO])

    # --- fused feature-side GEMM: [nonlinear_loc | nonlinear_scale | mixture]
    # rows of w3 beyond H are zero, so feeding the full activated a2 is exact.
    a3 = jnp.dot(a2_act, w3, preferred_element_type=jnp.float32) + b3  # (T, 128)
    nl_loc = _softclamp(a3[:, 0:MO], -MAX_DEV, MAX_DEV)
    nl_sd = _softclamp(a3[:, MO:2 * MO], EPS, MAX_DEV)
    mix = _softclamp(a3[:, 2 * MO:2 * MO + M], -MAX_DEV, MAX_DEV)

    locs = gates * lin_loc + (1.0 - gates) * nl_loc
    sd = gates * csd + (1.0 - gates) * nl_sd

    # --- lane-dense 128-wide output slab: [mix | locs | sd | zero pad] ------
    out_ref[...] = jnp.zeros_like(out_ref)
    out_ref[:, 0:M] = mix
    out_ref[:, M:M + MO] = locs
    out_ref[:, M + MO:M + 2 * MO] = sd


# ---------------------------------------------------------------------------
# Wrapper
# ---------------------------------------------------------------------------
def cggmm_forward(x, w_blob, b_blob, *, mixture_num, output_dim, hidden_dim,
                  batch_tile=None):
    """Returns (mixture_logits [B,M], locs [B,M,O], scale_diags [B,M,O])."""
    B, d_in = x.shape
    H = hidden_dim
    MO = mixture_num * output_dim
    M = mixture_num
    assert d_in % 8 == 0, "pad input_dim to a multiple of 8"
    assert 2 * H + MO <= LANES and H + MO <= LANES and 2 * MO + M <= LANES
    assert w_blob.shape == (d_in + 2 * LANES, LANES)
    assert b_blob.shape == (8, LANES)

    if batch_tile is None:
        if B <= 512:
            batch_tile = B                      # single grid step for small batches
        else:
            batch_tile = next(t for t in (1024, 512, 256, 128, 64, 32, 16, 8)
                              if B % t == 0)
    assert B % batch_tile == 0 and batch_tile % 8 == 0

    kernel = functools.partial(_cggmm_kernel, d_in=d_in, hidden=H, mo=MO, m=M)

    # advisory cost estimate so XLA schedules the custom call cheaply
    flops = 2 * B * (d_in + 2 * LANES) * LANES
    transcendentals = B * (4 * (3 * MO + M) + MO)
    bytes_accessed = 4 * (x.size + w_blob.size + b_blob.size + B * LANES)

    out = pl.pallas_call(
        kernel,
        out_shape=jax.ShapeDtypeStruct((B, LANES), jnp.float32),
        grid_spec=pltpu.PrefetchScalarGridSpec(
            num_scalar_prefetch=0,
            grid=(B // batch_tile,),
            in_specs=[
                pl.BlockSpec((batch_tile, d_in), lambda i: (i, 0)),
                pl.BlockSpec(w_blob.shape, lambda i: (0, 0)),   # resident across grid
                pl.BlockSpec(b_blob.shape, lambda i: (0, 0)),   # resident across grid
            ],
            out_specs=pl.BlockSpec((batch_tile, LANES), lambda i: (i, 0)),
        ),
        compiler_params=pltpu.CompilerParams(dimension_semantics=("parallel",)),
        cost_estimate=pl.CostEstimate(
            flops=flops, transcendentals=transcendentals,
            bytes_accessed=bytes_accessed),
    )(x, w_blob, b_blob)

    mix_logits = out[:, 0:M]
    locs = out[:, M:M + MO].reshape(B, mixture_num, output_dim)
    scale_diags = out[:, M + MO:M + 2 * MO].reshape(B, mixture_num, output_dim)
    return mix_logits, locs, scale_diags


# ---------------------------------------------------------------------------
# Parameter construction / packing
# ---------------------------------------------------------------------------
def _init_linear(key, fan_in, fan_out, bias_const=None):
    # PyTorch-default-like uniform init, stored as (in, out) for x @ W.
    kw, kb = jax.random.split(key)
    bound = 1.0 / jnp.sqrt(fan_in)
    w = jax.random.uniform(kw, (fan_in, fan_out), jnp.float32, -bound, bound)
    if bias_const is None:
        b = jax.random.uniform(kb, (1, fan_out), jnp.float32, -bound, bound)
    else:
        b = jnp.full((1, fan_out), bias_const, jnp.float32)
    return w, b


def make_params(key, input_dim, hidden_dim, mixture_num, output_dim):
    MO = mixture_num * output_dim
    ks = jax.random.split(key, 8)
    p = {}
    p["wf0"], p["bf0"] = _init_linear(ks[0], input_dim, hidden_dim)
    p["wf1"], p["bf1"] = _init_linear(ks[1], hidden_dim, hidden_dim)
    p["wg1"], p["bg1"] = _init_linear(ks[2], input_dim, hidden_dim)
    p["wg2"], p["bg2"] = _init_linear(ks[3], hidden_dim, MO)
    p["wll"], p["bll"] = _init_linear(ks[4], input_dim, MO)
    p["wnl"], p["bnl"] = _init_linear(ks[5], hidden_dim, MO)
    p["wsd"], p["bsd"] = _init_linear(ks[6], hidden_dim, MO, bias_const=0.05)  # init.constant_(bias, 0.05)
    p["wm"], p["bm"] = _init_linear(ks[7], hidden_dim, mixture_num)
    p["csd"] = jnp.full((1, MO), 0.05, jnp.float32)  # constant_scale_diag
    return p


def pack_params(p, *, input_dim, hidden_dim, mixture_num, output_dim):
    """Pack the 17 CGGMM parameters into one weight blob and one bias blob."""
    H = hidden_dim
    MO = mixture_num * output_dim
    M = mixture_num
    assert input_dim % 8 == 0
    assert 2 * H + MO <= LANES and H + MO <= LANES and 2 * MO + M <= LANES

    w1 = jnp.zeros((input_dim, LANES), jnp.float32)
    w1 = w1.at[:, 0:H].set(p["wf0"])
    w1 = w1.at[:, H:2 * H].set(p["wg1"])
    w1 = w1.at[:, 2 * H:2 * H + MO].set(p["wll"])

    w2 = jnp.zeros((LANES, LANES), jnp.float32)
    w2 = w2.at[0:H, 0:H].set(p["wf1"])
    w2 = w2.at[H:2 * H, H:H + MO].set(p["wg2"])

    w3 = jnp.zeros((LANES, LANES), jnp.float32)
    w3 = w3.at[0:H, 0:MO].set(p["wnl"])
    w3 = w3.at[0:H, MO:2 * MO].set(p["wsd"])
    w3 = w3.at[0:H, 2 * MO:2 * MO + M].set(p["wm"])

    w_blob = jnp.concatenate([w1, w2, w3], axis=0)        # (input_dim + 256, 128)

    b_blob = jnp.zeros((8, LANES), jnp.float32)
    b_blob = b_blob.at[0, 0:H].set(p["bf0"][0])
    b_blob = b_blob.at[0, H:2 * H].set(p["bg1"][0])
    b_blob = b_blob.at[0, 2 * H:2 * H + MO].set(p["bll"][0])
    b_blob = b_blob.at[1, 0:H].set(p["bf1"][0])
    b_blob = b_blob.at[1, H:H + MO].set(p["bg2"][0])
    b_blob = b_blob.at[2, 0:MO].set(p["bnl"][0])
    b_blob = b_blob.at[2, MO:2 * MO].set(p["bsd"][0])
    b_blob = b_blob.at[2, 2 * MO:2 * MO + M].set(p["bm"][0])
    # constant_scale_diag is softclamped ONCE here (hoisted out of the kernel)
    b_blob = b_blob.at[3, 0:MO].set(_softclamp(p["csd"][0], EPS, MAX_DEV))
    return w_blob, b_blob


# ---------------------------------------------------------------------------
# Pure-JAX reference (unfused path)
# ---------------------------------------------------------------------------
def cggmm_reference(x, p, mixture_num, output_dim):
    h = _leaky_relu(x @ p["wf0"] + p["bf0"])
    h = _leaky_relu(h @ p["wf1"] + p["bf1"])
    g = _leaky_relu(x @ p["wg1"] + p["bg1"])
    gates = jax.nn.sigmoid(g @ p["wg2"] + p["bg2"])
    lin_loc = _softclamp(x @ p["wll"] + p["bll"], -MAX_DEV, MAX_DEV)
    nl_loc = _softclamp(h @ p["wnl"] + p["bnl"], -MAX_DEV, MAX_DEV)
    locs = gates * lin_loc + (1 - gates) * nl_loc
    csd = _softclamp(p["csd"], EPS, MAX_DEV)
    nl_sd = _softclamp(h @ p["wsd"] + p["bsd"], EPS, MAX_DEV)
    sd = gates * csd + (1 - gates) * nl_sd
    mix = _softclamp(h @ p["wm"] + p["bm"], -MAX_DEV, MAX_DEV)
    B = x.shape[0]
    return mix, locs.reshape(B, mixture_num, output_dim), sd.reshape(B, mixture_num, output_dim)


if __name__ == "__main__":
    INPUT_DIM, HIDDEN_DIM, MIXTURE_NUM, OUTPUT_DIM = 16, 32, 4, 8
    B = 16

    key = jax.random.PRNGKey(0)
    k_x, k_p = jax.random.split(key)
    x = jax.random.normal(k_x, (B, INPUT_DIM), jnp.float32)
    params = make_params(k_p, INPUT_DIM, HIDDEN_DIM, MIXTURE_NUM, OUTPUT_DIM)
    w_blob, b_blob = pack_params(params, input_dim=INPUT_DIM, hidden_dim=HIDDEN_DIM,
                                 mixture_num=MIXTURE_NUM, output_dim=OUTPUT_DIM)

    fwd = jax.jit(
        functools.partial(
            cggmm_forward,
            mixture_num=MIXTURE_NUM, output_dim=OUTPUT_DIM, hidden_dim=HIDDEN_DIM,
        )
    )
    mix_logits, locs, scale_diags = jax.block_until_ready(fwd(x, w_blob, b_blob))

    # correctness check vs pure-JAX (unfused) reference
    mix_r, locs_r, sd_r = cggmm_reference(x, params, MIXTURE_NUM, OUTPUT_DIM)
    assert jnp.allclose(mix_logits, mix_r, atol=1e-5, rtol=1e-5)
    assert jnp.allclose(locs, locs_r, atol=1e-5, rtol=1e-5)
    assert jnp.allclose(scale_diags, sd_r, atol=1e-5, rtol=1e-5)
    assert scale_diags.shape == (B, MIXTURE_NUM, OUTPUT_DIM)

    print("KERNEL_OK")
</pallas_src>

<mosaic_0001>
module attributes {stable_mosaic.version = 11 : i64} {
  func.func @_cggmm_kernel(%arg0: i32, %arg1: memref<16x16xf32, #tpu.memory_space<vmem>>, %arg2: memref<272x128xf32, #tpu.memory_space<vmem>>, %arg3: memref<8x128xf32, #tpu.memory_space<vmem>>, %arg4: memref<16x128xf32, #tpu.memory_space<vmem>>) attributes {dimension_semantics = [#tpu.dimension_semantics<parallel>], iteration_bounds = array<i64: 1>, scalar_prefetch = 0 : i64, scratch_operands = 0 : i64, tpu.core_type = #tpu.core_type<tc>, window_params = [{transform_indices = @transform_0, window_bounds = array<i64: 16, 16>}, {pipeline_mode = #tpu.pipeline_mode<synchronous>, transform_indices = @transform_1, window_bounds = array<i64: 272, 128>}, {pipeline_mode = #tpu.pipeline_mode<synchronous>, transform_indices = @transform_2, window_bounds = array<i64: 8, 128>}, {transform_indices = @transform_3, window_bounds = array<i64: 16, 128>}]} {
    %c0 = arith.constant 0 : index
    %c0_0 = arith.constant 0 : index
    %0 = vector.load %arg1[%c0, %c0_0] : memref<16x16xf32, #tpu.memory_space<vmem>>, vector<16x16xf32>
    %c0_1 = arith.constant 0 : index
    %c0_2 = arith.constant 0 : index
    %1 = vector.load %arg2[%c0_1, %c0_2] : memref<272x128xf32, #tpu.memory_space<vmem>>, vector<16x128xf32>
    %c16 = arith.constant 16 : index
    %c0_3 = arith.constant 0 : index
    %2 = vector.load %arg2[%c16, %c0_3] : memref<272x128xf32, #tpu.memory_space<vmem>>, vector<128x128xf32>
    %c144 = arith.constant 144 : index
    %c0_4 = arith.constant 0 : index
    %3 = vector.load %arg2[%c144, %c0_4] : memref<272x128xf32, #tpu.memory_space<vmem>>, vector<128x128xf32>
    %c0_5 = arith.constant 0 : index
    %c0_6 = arith.constant 0 : index
    %4 = vector.load %arg3[%c0_5, %c0_6] : memref<8x128xf32, #tpu.memory_space<vmem>>, vector<1x128xf32>
    %c1 = arith.constant 1 : index
    %c0_7 = arith.constant 0 : index
    %5 = vector.load %arg3[%c1, %c0_7] : memref<8x128xf32, #tpu.memory_space<vmem>>, vector<1x128xf32>
    %c2 = arith.constant 2 : index
    %c0_8 = arith.constant 0 : index
    %6 = vector.load %arg3[%c2, %c0_8] : memref<8x128xf32, #tpu.memory_space<vmem>>, vector<1x128xf32>
    %c3 = arith.constant 3 : index
    %c0_9 = arith.constant 0 : index
    %7 = vector.load %arg3[%c3, %c0_9] : memref<8x128xf32, #tpu.memory_space<vmem>>, vector<1x32xf32>
    %cst = arith.constant dense<0.000000e+00> : vector<16x128xf32>
    %8 = tpu.matmul %0, %1, %cst {dimension_numbers = #tpu.dot_dimension_numbers<[1], [0], [0], [1], [0, 0, 1, 1], [], []>} : vector<16x16xf32>, vector<16x128xf32>, vector<16x128xf32> -> vector<16x128xf32>
    %9 = vector.broadcast %4 : vector<1x128xf32> to vector<16x128xf32>
    %10 = arith.addf %8, %9 : vector<16x128xf32>
    %cst_10 = arith.constant 0.000000e+00 : f32
    %11 = vector.broadcast %cst_10 : f32 to vector<16x128xf32>
    %12 = arith.cmpf oge, %10, %11 : vector<16x128xf32>
    %cst_11 = arith.constant 0.00999999977 : f32
    %13 = vector.broadcast %cst_11 : f32 to vector<16x128xf32>
    %14 = arith.mulf %13, %10 : vector<16x128xf32>
    %15 = arith.select %12, %10, %14 : vector<16x128xi1>, vector<16x128xf32>
    %16 = vector.extract_strided_slice %10 {offsets = [0, 64], sizes = [16, 32], strides = [1, 1]} : vector<16x128xf32> to vector<16x32xf32>
    %cst_12 = arith.constant -5.000000e+00 : f32
    %17 = vector.broadcast %cst_12 : f32 to vector<16x32xf32>
    %18 = arith.subf %16, %17 : vector<16x32xf32>
    %cst_13 = arith.constant 0.000000e+00 : f32
    %19 = vector.broadcast %cst_13 : f32 to vector<16x32xf32>
    %20 = arith.maximumf %18, %19 : vector<16x32xf32>
    %21 = vector.broadcast %cst_13 : f32 to vector<16x32xf32>
    %22 = arith.subf %18, %21 : vector<16x32xf32>
    %23 = arith.cmpf one, %22, %22 : vector<16x32xf32>
    %24 = vector.broadcast %cst_13 : f32 to vector<16x32xf32>
    %25 = arith.addf %18, %24 : vector<16x32xf32>
    %26 = math.absf %22 : vector<16x32xf32>
    %cst_14 = arith.constant 0.000000e+00 : f32
    %27 = vector.broadcast %cst_14 : f32 to vector<16x32xf32>
    %28 = arith.subf %27, %26 : vector<16x32xf32>
    %29 = math.exp %28 : vector<16x32xf32>
    %30 = math.log1p %29 : vector<16x32xf32>
    %31 = arith.addf %20, %30 : vector<16x32xf32>
    %32 = arith.select %23, %25, %31 : vector<16x32xi1>, vector<16x32xf32>
    %cst_15 = arith.constant -5.000000e+00 : f32
    %33 = vector.broadcast %cst_15 : f32 to vector<16x32xf32>
    %34 = arith.addf %33, %32 : vector<16x32xf32>
    %cst_16 = arith.constant 5.000000e+00 : f32
    %35 = vector.broadcast %cst_16 : f32 to vector<16x32xf32>
    %36 = arith.subf %35, %34 : vector<16x32xf32>
    %cst_17 = arith.constant 0.000000e+00 : f32
    %37 = vector.broadcast %cst_17 : f32 to vector<16x32xf32>
    %38 = arith.maximumf %36, %37 : vector<16x32xf32>
    %39 = vector.broadcast %cst_17 : f32 to vector<16x32xf32>
    %40 = arith.subf %36, %39 : vector<16x32xf32>
    %41 = arith.cmpf one, %40, %40 : vector<16x32xf32>
    %42 = vector.broadcast %cst_17 : f32 to vector<16x32xf32>
    %43 = arith.addf %36, %42 : vector<16x32xf32>
    %44 = math.absf %40 : vector<16x32xf32>
    %cst_18 = arith.constant 0.000000e+00 : f32
    %45 = vector.broadcast %cst_18 : f32 to vector<16x32xf32>
    %46 = arith.subf %45, %44 : vector<16x32xf32>
    %47 = math.exp %46 : vector<16x32xf32>
    %48 = math.log1p %47 : vector<16x32xf32>
    %49 = arith.addf %38, %48 : vector<16x32xf32>
    %50 = arith.select %41, %43, %49 : vector<16x32xi1>, vector<16x32xf32>
    %cst_19 = arith.constant 5.000000e+00 : f32
    %51 = vector.broadcast %cst_19 : f32 to vector<16x32xf32>
    %52 = arith.subf %51, %50 : vector<16x32xf32>
    %cst_20 = arith.constant dense<0.000000e+00> : vector<16x128xf32>
    %53 = tpu.matmul %15, %2, %cst_20 {dimension_numbers = #tpu.dot_dimension_numbers<[1], [0], [0], [1], [0, 0, 1, 1], [], []>} : vector<16x128xf32>, vector<128x128xf32>, vector<16x128xf32> -> vector<16x128xf32>
    %54 = vector.broadcast %5 : vector<1x128xf32> to vector<16x128xf32>
    %55 = arith.addf %53, %54 : vector<16x128xf32>
    %cst_21 = arith.constant 0.000000e+00 : f32
    %56 = vector.broadcast %cst_21 : f32 to vector<16x128xf32>
    %57 = arith.cmpf oge, %55, %56 : vector<16x128xf32>
    %cst_22 = arith.constant 0.00999999977 : f32
    %58 = vector.broadcast %cst_22 : f32 to vector<16x128xf32>
    %59 = arith.mulf %58, %55 : vector<16x128xf32>
    %60 = arith.select %57, %55, %59 : vector<16x128xi1>, vector<16x128xf32>
    %61 = vector.extract_strided_slice %55 {offsets = [0, 32], sizes = [16, 32], strides = [1, 1]} : vector<16x128xf32> to vector<16x32xf32>
    %62 = arith.negf %61 : vector<16x32xf32>
    %63 = math.exp %62 : vector<16x32xf32>
    %cst_23 = arith.constant 1.000000e+00 : f32
    %64 = vector.broadcast %cst_23 : f32 to vector<16x32xf32>
    %65 = arith.addf %64, %63 : vector<16x32xf32>
    %66 = arith.divf %64, %65 : vector<16x32xf32>
    %cst_24 = arith.constant dense<0.000000e+00> : vector<16x128xf32>
    %67 = tpu.matmul %60, %3, %cst_24 {dimension_numbers = #tpu.dot_dimension_numbers<[1], [0], [0], [1], [0, 0, 1, 1], [], []>} : vector<16x128xf32>, vector<128x128xf32>, vector<16x128xf32> -> vector<16x128xf32>
    %68 = vector.broadcast %6 : vector<1x128xf32> to vector<16x128xf32>
    %69 = arith.addf %67, %68 : vector<16x128xf32>
    %70 = vector.extract_strided_slice %69 {offsets = [0, 0], sizes = [16, 32], strides = [1, 1]} : vector<16x128xf32> to vector<16x32xf32>
    %cst_25 = arith.constant -5.000000e+00 : f32
    %71 = vector.broadcast %cst_25 : f32 to vector<16x32xf32>
    %72 = arith.subf %70, %71 : vector<16x32xf32>
    %cst_26 = arith.constant 0.000000e+00 : f32
    %73 = vector.broadcast %cst_26 : f32 to vector<16x32xf32>
    %74 = arith.maximumf %72, %73 : vector<16x32xf32>
    %75 = vector.broadcast %cst_26 : f32 to vector<16x32xf32>
    %76 = arith.subf %72, %75 : vector<16x32xf32>
    %77 = arith.cmpf one, %76, %76 : vector<16x32xf32>
    %78 = vector.broadcast %cst_26 : f32 to vector<16x32xf32>
    %79 = arith.addf %72, %78 : vector<16x32xf32>
    %80 = math.absf %76 : vector<16x32xf32>
    %cst_27 = arith.constant 0.000000e+00 : f32
    %81 = vector.broadcast %cst_27 : f32 to vector<16x32xf32>
    %82 = arith.subf %81, %80 : vector<16x32xf32>
    %83 = math.exp %82 : vector<16x32xf32>
    %84 = math.log1p %83 : vector<16x32xf32>
    %85 = arith.addf %74, %84 : vector<16x32xf32>
    %86 = arith.select %77, %79, %85 : vector<16x32xi1>, vector<16x32xf32>
    %cst_28 = arith.constant -5.000000e+00 : f32
    %87 = vector.broadcast %cst_28 : f32 to vector<16x32xf32>
    %88 = arith.addf %87, %86 : vector<16x32xf32>
    %cst_29 = arith.constant 5.000000e+00 : f32
    %89 = vector.broadcast %cst_29 : f32 to vector<16x32xf32>
    %90 = arith.subf %89, %88 : vector<16x32xf32>
    %cst_30 = arith.constant 0.000000e+00 : f32
    %91 = vector.broadcast %cst_30 : f32 to vector<16x32xf32>
    %92 = arith.maximumf %90, %91 : vector<16x32xf32>
    %93 = vector.broadcast %cst_30 : f32 to vector<16x32xf32>
    %94 = arith.subf %90, %93 : vector<16x32xf32>
    %95 = arith.cmpf one, %94, %94 : vector<16x32xf32>
    %96 = vector.broadcast %cst_30 : f32 to vector<16x32xf32>
    %97 = arith.addf %90, %96 : vector<16x32xf32>
    %98 = math.absf %94 : vector<16x32xf32>
    %cst_31 = arith.constant 0.000000e+00 : f32
    %99 = vector.broadcast %cst_31 : f32 to vector<16x32xf32>
    %100 = arith.subf %99, %98 : vector<16x32xf32>
    %101 = math.exp %100 : vector<16x32xf32>
    %102 = math.log1p %101 : vector<16x32xf32>
    %103 = arith.addf %92, %102 : vector<16x32xf32>
    %104 = arith.select %95, %97, %103 : vector<16x32xi1>, vector<16x32xf32>
    %cst_32 = arith.constant 5.000000e+00 : f32
    %105 = vector.broadcast %cst_32 : f32 to vector<16x32xf32>
    %106 = arith.subf %105, %104 : vector<16x32xf32>
    %107 = vector.extract_strided_slice %69 {offsets = [0, 32], sizes = [16, 32], strides = [1, 1]} : vector<16x128xf32> to vector<16x32xf32>
    %cst_33 = arith.constant 1.000000e-03 : f32
    %108 = vector.broadcast %cst_33 : f32 to vector<16x32xf32>
    %109 = arith.subf %107, %108 : vector<16x32xf32>
    %cst_34 = arith.constant 0.000000e+00 : f32
    %110 = vector.broadcast %cst_34 : f32 to vector<16x32xf32>
    %111 = arith.maximumf %109, %110 : vector<16x32xf32>
    %112 = vector.broadcast %cst_34 : f32 to vector<16x32xf32>
    %113 = arith.subf %109, %112 : vector<16x32xf32>
    %114 = arith.cmpf one, %113, %113 : vector<16x32xf32>
    %115 = vector.broadcast %cst_34 : f32 to vector<16x32xf32>
    %116 = arith.addf %109, %115 : vector<16x32xf32>
    %117 = math.absf %113 : vector<16x32xf32>
    %cst_35 = arith.constant 0.000000e+00 : f32
    %118 = vector.broadcast %cst_35 : f32 to vector<16x32xf32>
    %119 = arith.subf %118, %117 : vector<16x32xf32>
    %120 = math.exp %119 : vector<16x32xf32>
    %121 = math.log1p %120 : vector<16x32xf32>
    %122 = arith.addf %111, %121 : vector<16x32xf32>
    %123 = arith.select %114, %116, %122 : vector<16x32xi1>, vector<16x32xf32>
    %cst_36 = arith.constant 1.000000e-03 : f32
    %124 = vector.broadcast %cst_36 : f32 to vector<16x32xf32>
    %125 = arith.addf %124, %123 : vector<16x32xf32>
    %cst_37 = arith.constant 5.000000e+00 : f32
    %126 = vector.broadcast %cst_37 : f32 to vector<16x32xf32>
    %127 = arith.subf %126, %125 : vector<16x32xf32>
    %cst_38 = arith.constant 0.000000e+00 : f32
    %128 = vector.broadcast %cst_38 : f32 to vector<16x32xf32>
    %129 = arith.maximumf %127, %128 : vector<16x32xf32>
    %130 = vector.broadcast %cst_38 : f32 to vector<16x32xf32>
    %131 = arith.subf %127, %130 : vector<16x32xf32>
    %132 = arith.cmpf one, %131, %131 : vector<16x32xf32>
    %133 = vector.broadcast %cst_38 : f32 to vector<16x32xf32>
    %134 = arith.addf %127, %133 : vector<16x32xf32>
    %135 = math.absf %131 : vector<16x32xf32>
    %cst_39 = arith.constant 0.000000e+00 : f32
    %136 = vector.broadcast %cst_39 : f32 to vector<16x32xf32>
    %137 = arith.subf %136, %135 : vector<16x32xf32>
    %138 = math.exp %137 : vector<16x32xf32>
    %139 = math.log1p %138 : vector<16x32xf32>
    %140 = arith.addf %129, %139 : vector<16x32xf32>
    %141 = arith.select %132, %134, %140 : vector<16x32xi1>, vector<16x32xf32>
    %cst_40 = arith.constant 5.000000e+00 : f32
    %142 = vector.broadcast %cst_40 : f32 to vector<16x32xf32>
    %143 = arith.subf %142, %141 : vector<16x32xf32>
    %144 = vector.extract_strided_slice %69 {offsets = [0, 64], sizes = [16, 4], strides = [1, 1]} : vector<16x128xf32> to vector<16x4xf32>
    %cst_41 = arith.constant -5.000000e+00 : f32
    %145 = vector.broadcast %cst_41 : f32 to vector<16x4xf32>
    %146 = arith.subf %144, %145 : vector<16x4xf32>
    %cst_42 = arith.constant 0.000000e+00 : f32
    %147 = vector.broadcast %cst_42 : f32 to vector<16x4xf32>
    %148 = arith.maximumf %146, %147 : vector<16x4xf32>
    %149 = vector.broadcast %cst_42 : f32 to vector<16x4xf32>
    %150 = arith.subf %146, %149 : vector<16x4xf32>
    %151 = arith.cmpf one, %150, %150 : vector<16x4xf32>
    %152 = vector.broadcast %cst_42 : f32 to vector<16x4xf32>
    %153 = arith.addf %146, %152 : vector<16x4xf32>
    %154 = math.absf %150 : vector<16x4xf32>
    %cst_43 = arith.constant 0.000000e+00 : f32
    %155 = vector.broadcast %cst_43 : f32 to vector<16x4xf32>
    %156 = arith.subf %155, %154 : vector<16x4xf32>
    %157 = math.exp %156 : vector<16x4xf32>
    %158 = math.log1p %157 : vector<16x4xf32>
    %159 = arith.addf %148, %158 : vector<16x4xf32>
    %160 = arith.select %151, %153, %159 : vector<16x4xi1>, vector<16x4xf32>
    %cst_44 = arith.constant -5.000000e+00 : f32
    %161 = vector.broadcast %cst_44 : f32 to vector<16x4xf32>
    %162 = arith.addf %161, %160 : vector<16x4xf32>
    %cst_45 = arith.constant 5.000000e+00 : f32
    %163 = vector.broadcast %cst_45 : f32 to vector<16x4xf32>
    %164 = arith.subf %163, %162 : vector<16x4xf32>
    %cst_46 = arith.constant 0.000000e+00 : f32
    %165 = vector.broadcast %cst_46 : f32 to vector<16x4xf32>
    %166 = arith.maximumf %164, %165 : vector<16x4xf32>
    %167 = vector.broadcast %cst_46 : f32 to vector<16x4xf32>
    %168 = arith.subf %164, %167 : vector<16x4xf32>
    %169 = arith.cmpf one, %168, %168 : vector<16x4xf32>
    %170 = vector.broadcast %cst_46 : f32 to vector<16x4xf32>
    %171 = arith.addf %164, %170 : vector<16x4xf32>
    %172 = math.absf %168 : vector<16x4xf32>
    %cst_47 = arith.constant 0.000000e+00 : f32
    %173 = vector.broadcast %cst_47 : f32 to vector<16x4xf32>
    %174 = arith.subf %173, %172 : vector<16x4xf32>
    %175 = math.exp %174 : vector<16x4xf32>
    %176 = math.log1p %175 : vector<16x4xf32>
    %177 = arith.addf %166, %176 : vector<16x4xf32>
    %178 = arith.select %169, %171, %177 : vector<16x4xi1>, vector<16x4xf32>
    %cst_48 = arith.constant 5.000000e+00 : f32
    %179 = vector.broadcast %cst_48 : f32 to vector<16x4xf32>
    %180 = arith.subf %179, %178 : vector<16x4xf32>
    %181 = arith.mulf %66, %52 : vector<16x32xf32>
    %cst_49 = arith.constant 1.000000e+00 : f32
    %182 = vector.broadcast %cst_49 : f32 to vector<16x32xf32>
    %183 = arith.subf %182, %66 : vector<16x32xf32>
    %184 = arith.mulf %183, %106 : vector<16x32xf32>
    %185 = arith.addf %181, %184 : vector<16x32xf32>
    %186 = vector.broadcast %7 : vector<1x32xf32> to vector<16x32xf32>
    %187 = arith.mulf %66, %186 : vector<16x32xf32>
    %cst_50 = arith.constant 1.000000e+00 : f32
    %188 = vector.broadcast %cst_50 : f32 to vector<16x32xf32>
    %189 = arith.subf %188, %66 : vector<16x32xf32>
    %190 = arith.mulf %189, %143 : vector<16x32xf32>
    %191 = arith.addf %187, %190 : vector<16x32xf32>
    %cst_51 = arith.constant 0.000000e+00 : f32
    %192 = vector.broadcast %cst_51 : f32 to vector<16x128xf32>
    %c0_52 = arith.constant 0 : index
    %c0_53 = arith.constant 0 : index
    %193 = vector.load %arg4[%c0_52, %c0_53] : memref<16x128xf32, #tpu.memory_space<vmem>>, vector<16x128xf32>
    tpu.vector_store %arg4[%c0_52, %c0_53], %192 {strides = array<i32>} : memref<16x128xf32, #tpu.memory_space<vmem>>, vector<16x128xf32>,
    %c0_54 = arith.constant 0 : index
    %c0_55 = arith.constant 0 : index
    %194 = vector.load %arg4[%c0_54, %c0_55] : memref<16x128xf32, #tpu.memory_space<vmem>>, vector<16x4xf32>
    tpu.vector_store %arg4[%c0_54, %c0_55], %180 {strides = array<i32>} : memref<16x128xf32, #tpu.memory_space<vmem>>, vector<16x4xf32>,
    %c0_56 = arith.constant 0 : index
    %c4 = arith.constant 4 : index
    %195 = vector.load %arg4[%c0_56, %c4] : memref<16x128xf32, #tpu.memory_space<vmem>>, vector<16x32xf32>
    tpu.vector_store %arg4[%c0_56, %c4], %185 {strides = array<i32>} : memref<16x128xf32, #tpu.memory_space<vmem>>, vector<16x32xf32>,
    %c0_57 = arith.constant 0 : index
    %c36 = arith.constant 36 : index
    %196 = vector.load %arg4[%c0_57, %c36] : memref<16x128xf32, #tpu.memory_space<vmem>>, vector<16x32xf32>
    tpu.vector_store %arg4[%c0_57, %c36], %191 {strides = array<i32>} : memref<16x128xf32, #tpu.memory_space<vmem>>, vector<16x32xf32>,
    return
  }
  func.func @transform_0(%arg0: i32) -> (i32, i32) {
    %c0_i32 = arith.constant 0 : i32
    %c0_i32_0 = arith.constant 0 : i32
    return %arg0, %c0_i32 : i32, i32
  }
  func.func @transform_1(%arg0: i32) -> (i32, i32) {
    %c0_i32 = arith.constant 0 : i32
    %c0_i32_0 = arith.constant 0 : i32
    %c0_i32_1 = arith.constant 0 : i32
    return %c0_i32, %c0_i32_0 : i32, i32
  }
  func.func @transform_2(%arg0: i32) -> (i32, i32) {
    %c0_i32 = arith.constant 0 : i32
    %c0_i32_0 = arith.constant 0 : i32
    %c0_i32_1 = arith.constant 0 : i32
    return %c0_i32, %c0_i32_0 : i32, i32
  }
  func.func @transform_3(%arg0: i32) -> (i32, i32) {
    %c0_i32 = arith.constant 0 : i32
    %c0_i32_0 = arith.constant 0 : i32
    return %arg0, %c0_i32 : i32, i32
  }
}

</mosaic_0001>

<bundles_post_ra>
// kernel: cggmm_forward.1
= control target key start
LH: loop header
LB: loop body
LE: loop exit
PB: predicated region body
PF: predicated region fallthrough
CT: control target
= control target key end

     0   :  { %8 = vsyncpa [#allocation3], 0  ;;  %s914_s0 = inlined_call_operand.hbm [shape: f32[16,16], index: 0, kind: input, shape index: {}]   ;;  %s915_s1 = inlined_call_operand.hbm [shape: f32[272,128], index: 1, kind: input, shape index: {}]   ;;  %s916_s2 = inlined_call_operand.hbm [shape: f32[8,128], index: 2, kind: input, shape index: {}]   ;;  %s917_s3 = inlined_call_operand.vmem [shape: f32[16,128], index: 3, kind: output, shape index: {}]  }
   0x1   :  { %9 = vsyncpa [#allocation5], 0  ;;  %s27_s14 = sshll.u32 %s915_s1, 4  ;;  %s731_s15 = smov [#allocation4]   ;;  %s28_s14 = int_to_ptr.hbm [resolvable:$true] %s27_s14 }
   0x2   :  { %s29_s16 = sshll.u32 %s731_s15, 4  ;;  %s14_s19 = sshll.u32 %s914_s0, 4  ;;  %s30_s16 = int_to_ptr.vmem [resolvable:$true] %s29_s16  ;;  %s15_s19 = int_to_ptr.hbm [resolvable:$true] %s14_s19 }
   0x3   :  { %s732_s20 = smov 128   ;;  %s733_s21 = smov 8  }
   0x4   :  { %35 = dma.hbm_to_vmem [thread:$0]  %s28_s14, 4352, %s30_s16, [#allocation5], %s732_s20, %s732_s20, %s733_s21  }
   0x5   :  { %s734_s22 = smov [#allocation2]   ;;  %s41_s26 = sshll.u32 %s916_s2, 4  ;;  %s42_s26 = int_to_ptr.hbm [resolvable:$true] %s41_s26 }
   0x6   :  { %s16_s23 = sshll.u32 %s734_s22, 4  ;;  %s735_s1 = smov [#allocation6]   ;;  %s17_s23 = int_to_ptr.vmem [resolvable:$true] %s16_s23 }
   0x7   :  { %22 = dma.hbm_to_vmem [thread:$0]  %s15_s19, 256, %s17_s23, [#allocation3], %s732_s20, %s732_s20, %s733_s21  }
   0x8   :  { %s43_s27 = sshll.u32 %s735_s1, 4  ;;  %s44_s27 = int_to_ptr.vmem [resolvable:$true] %s43_s27 }
   0x9   :  { %46 = dma.hbm_to_vmem [thread:$0]  %s42_s26, 128, %s44_s27, [#allocation5]  }
   0xa   :  { %727 = dma.done.wait [#allocation3], 256  }
   0xb   :  { %728 = vsyncadd [#allocation3], 4294967040 }
   0xc   :  { %729 = dma.done.wait [#allocation5], 4480  }
   0xd   :  { %730 = vsyncadd [#allocation5], 4294962816  ;;  %v62_v0 = vld [vmem:[#allocation4 + $0x8] sm:$0xff]  ;;  %v61_v1 = vld [vmem:[#allocation4] sm:$0xff]  ;;  %vm100_vm0 = vcmask 130048   ;;  %s736_s0 = smov 32  }
   0xe   :  { %121 = vmatpush.msra.mxu0 %v62_v0  ;;  %v59_v2 = vld [vmem:[#allocation2] sm:$0xff]  ;;  %v78_v3 = vld [vmem:[#allocation4 + $0x88] sm:$0xff]  ;;  %v77_v4 = vld [vmem:[#allocation4 + $0x80] sm:$0xff]  ;;  %s737_s2 = smov 96   ;;  %s739_s5 = smov 64  }
   0xf   :  { %217 = vmatpush.msra.mxu1 %v78_v3  ;;  %552 = vmatpush.msra.mxu3 %v78_v3  ;;  %v76_v5 = vld [vmem:[#allocation4 + $0x78] sm:$0xff]  ;;  %v75_v6 = vld [vmem:[#allocation4 + $0x70] sm:$0xff]  ;;  %v74_v7 = vld [vmem:[#allocation4 + $0x68] sm:$0xff]  ;;  %s740_s6 = smov 4   ;;  %s741_s9 = smov 100  }
  0x10   :  { %122 = vmatpush.msra.mxu0 %v61_v1  ;;  %v60_v8 = vld [vmem:[#allocation2 + $0x8] sm:$0xff]  ;;  %v73_v9 = vld [vmem:[#allocation4 + $0x60] sm:$0xff]  ;;  %v71_v11 = vld [vmem:[#allocation4 + $0x50] sm:$0xff] }
  0x11   :  { %542 = vmatmul.msk.f32.vlgmr.msra.gmra.mxu0 %vm100_vm0, %v59_v2  ;;  %218 = vmatpush.msra.mxu1 %v77_v4  ;;  %v72_v10 = vld [vmem:[#allocation4 + $0x58] sm:$0xff]  ;;  %v70_v12 = vld [vmem:[#allocation4 + $0x48] sm:$0xff]  ;;  %v69_v13 = vld [vmem:[#allocation4 + $0x40] sm:$0xff] }
  0x12   :  { %553 = vmatpush.msra.mxu3 %v77_v4  ;;  %v68_v14 = vld [vmem:[#allocation4 + $0x38] sm:$0xff]  ;;  %v67_v15 = vld [vmem:[#allocation4 + $0x30] sm:$0xff]  ;;  %v66_v16 = vld [vmem:[#allocation4 + $0x28] sm:$0xff] }
  0x13   :  { %219 = vmatpush.msra.mxu1 %v76_v5  ;;  %v65_v17 = vld [vmem:[#allocation4 + $0x20] sm:$0xff]  ;;  %v64_v18 = vld [vmem:[#allocation4 + $0x18] sm:$0xff]  ;;  %v63_v19 = vld [vmem:[#allocation4 + $0x10] sm:$0xff] }
  0x14   :  { %554 = vmatpush.msra.mxu3 %v76_v5  ;;  %v595_v20 = vld [vmem:[#allocation6] ss:$0 sm:$0xff]  ;;  %v596_v58 = vld [vmem:[#allocation6 + $0x3] ss:$0 sm:$0xff]  ;;  %v94_v5 = vld [vmem:[#allocation4 + $0x108] sm:$0xff] }
  0x15   :  { %220 = vmatpush.msra.mxu1 %v75_v6  ;;  %494 = vrot.lane.b32.xlu2 %v596_v58, %s736_s0 }
  0x16   :  { %555 = vmatpush.msra.mxu3 %v75_v6  ;;  %v93_v6 = vld [vmem:[#allocation4 + $0x100] sm:$0xff]  ;;  %285 = vmatpush.msrb.mxu0 %v94_v5 }
  0x17   :  { %221 = vmatpush.msra.mxu1 %v74_v7  ;;  %568 = vmatpush.msra.mxu2 %v94_v5 }
  0x18   :  { %556 = vmatpush.msra.mxu3 %v74_v7  ;;  %286 = vmatpush.msrb.mxu0 %v93_v6 }
  0x19   :  { %543 = vmatmul.msk.f32.gmra.mxu0 %vm100_vm0, %v60_v8  ;;  %222 = vmatpush.msra.mxu1 %v73_v9  ;;  %v92_v8 = vld [vmem:[#allocation4 + $0xf8] sm:$0xff] }
  0x1a   :  { %557 = vmatpush.msra.mxu3 %v73_v9  ;;  %569 = vmatpush.msra.mxu2 %v93_v6 }
  0x1b   :  { %223 = vmatpush.msra.mxu1 %v72_v10  ;;  %287 = vmatpush.msrb.mxu0 %v92_v8 }
  0x1c   :  { %558 = vmatpush.msra.mxu3 %v72_v10  ;;  %v91_v10 = vld [vmem:[#allocation4 + $0xf0] sm:$0xff]  ;;  %570 = vmatpush.msra.mxu2 %v92_v8 }
  0x1d   :  { %224 = vmatpush.msra.mxu1 %v71_v11  ;;  %288 = vmatpush.msrb.mxu0 %v91_v10 }
  0x1e   :  { %559 = vmatpush.msra.mxu3 %v71_v11  ;;  %571 = vmatpush.msra.mxu2 %v91_v10 }
  0x1f   :  { %225 = vmatpush.msra.mxu1 %v70_v12 }
  0x20   :  { %560 = vmatpush.msra.mxu3 %v70_v12 }
  0x21   :  { %226 = vmatpush.msra.mxu1 %v69_v13 }
  0x22   :  { %561 = vmatpush.msra.mxu3 %v69_v13  ;;  %v90_v13 = vld [vmem:[#allocation4 + $0xe8] sm:$0xff] }
  0x23   :  { %227 = vmatpush.msra.mxu1 %v68_v14  ;;  %289 = vmatpush.msrb.mxu0 %v90_v13 }
  0x24   :  { %562 = vmatpush.msra.mxu3 %v68_v14  ;;  %572 = vmatpush.msra.mxu2 %v90_v13 }
  0x25   :  { %228 = vmatpush.msra.mxu1 %v67_v15 }
  0x26   :  { %563 = vmatpush.msra.mxu3 %v67_v15 }
  0x27   :  { %229 = vmatpush.msra.mxu1 %v66_v16 }
  0x28   :  { %564 = vmatpush.msra.mxu3 %v66_v16  ;;  %v89_v16 = vld [vmem:[#allocation4 + $0xe0] sm:$0xff] }
  0x29   :  { %230 = vmatpush.msra.mxu1 %v65_v17  ;;  %290 = vmatpush.msrb.mxu0 %v89_v16 }
  0x2a   :  { %565 = vmatpush.msra.mxu3 %v65_v17  ;;  %v88_v17 = vld [vmem:[#allocation4 + $0xd8] sm:$0xff]  ;;  %573 = vmatpush.msra.mxu2 %v89_v16 }
  0x2b   :  { %231 = vmatpush.msra.mxu1 %v64_v18  ;;  %291 = vmatpush.msrb.mxu0 %v88_v17 }
  0x2c   :  { %566 = vmatpush.msra.mxu3 %v64_v18  ;;  %574 = vmatpush.msra.mxu2 %v88_v17 }
  0x2d   :  { %232 = vmatpush.msra.mxu1 %v63_v19 }
  0x2e   :  { %567 = vmatpush.msra.mxu3 %v63_v19  ;;  %v87_v19 = vld [vmem:[#allocation4 + $0xd0] sm:$0xff] }
  0x2f   :  { %292 = vmatpush.msrb.mxu0 %v87_v19  ;;  %575 = vmatpush.msra.mxu2 %v87_v19 }
  0x8e   :  { %v124_v21 = vpop.f32.mrf.mxu0 }
  0x8f   :  { %v125_v22 = vadd.f32 %v595_v20, %v124_v21 }
  0x91   :  { %v544_v23 = vadd.f32 5.0, %v125_v22  ;;  %vm130_vm1 = vcmp.ge.f32.partialorder %v125_v22, 0.0  ;;  %v132_v24 = vmul.f32 0.01, %v125_v22 }
  0x93   :  { %v144_v25 = vand.u32 2147483647, %v544_v23  ;;  %v134_v26 = vsel %vm130_vm1, %v125_v22, %v132_v24  ;;  %v138_v48 = vmax.f32 %v544_v23, 0.0  ;;  %vm140_vm4 = vcmp.ne.f32.partialorder %v544_v23, %v544_v23  ;;  %v86_v22 = vld [vmem:[#allocation4 + $0xc8] sm:$0xff] }
  0x94   :  { %233 = vmatmul.f32.vlgmr.msra.gmra.mxu1 %v134_v26  ;;  %293 = vmatpush.msrb.mxu0 %v86_v22 }
  0x95   :  { %v146_v27 = vsub.f32 0.0, %v144_v25  ;;  %576 = vmatpush.msra.mxu2 %v86_v22 }
  0x96   :  { %v127_v28 = vpop.f32.mrf.mxu0 }
  0x97   :  { %v148_v29 = vmul.f32 1.442695, %v146_v27  ;;  %v128_v30 = vadd.f32 %v595_v20, %v127_v28  ;;  %v85_v28 = vld [vmem:[#allocation4 + $0xc0] sm:$0xff] }
  0x98   :  { %294 = vmatpush.msrb.mxu0 %v85_v28  ;;  %577 = vmatpush.msra.mxu2 %v85_v28 }
  0x99   :  { %599 = vpow2.f32 %v148_v29  ;;  %v545_v31 = vadd.f32 5.0, %v128_v30  ;;  %vm131_vm2 = vcmp.ge.f32.partialorder %v128_v30, 0.0  ;;  %v133_v32 = vmul.f32 0.01, %v128_v30 }
  0x9b   :  { %v145_v33 = vand.u32 2147483647, %v545_v31  ;;  %v135_v34 = vsel %vm131_vm2, %v128_v30, %v133_v32  ;;  %v139_v60 = vmax.f32 %v545_v31, 0.0  ;;  %vm141_vm6 = vcmp.ne.f32.partialorder %v545_v31, %v545_v31 }
  0x9c   :  { %236 = vmatmul.f32.vlgmr.msra.gmra.mxu3 %v135_v34  ;;  %v83_v34 = vld [vmem:[#allocation4 + $0xb0] sm:$0xff] }
  0x9d   :  { %v147_v35 = vsub.f32 0.0, %v145_v33 }
  0x9f   :  { %v600_v36 = vpop.eup %599  ;;  %v150_v37 = vmul.f32 1.442695, %v147_v35 }
  0xa0   :  { %v152_v38 = vadd.f32 1.0, %v600_v36  ;;  %v155_v39 = vmul.f32 -0.5, %v600_v36  ;;  %v158_v41 = vand.u32 2147483647, %v600_v36 }
  0xa1   :  { %601 = vpow2.f32 %v150_v37 }
  0xa2   :  { %603 = vlog2.f32 %v152_v38  ;;  %v156_v40 = vadd.f32 1.0, %v155_v39  ;;  %vm159_vm3 = vcmp.lt.f32.partialorder %v158_v41, 0.0004427343  ;;  %v82_v38 = vld [vmem:[#allocation4 + $0xa8] sm:$0xff] }
  0xa4   :  { %v157_v47 = vmul.f32 %v600_v36, %v156_v40 }
  0xa7   :  { %v602_v42 = vpop.eup %601 }
  0xa8   :  { %v604_v43 = vpop.eup %603  ;;  %v161_v44 = vadd.f32 1.0, %v602_v42  ;;  %v164_v45 = vmul.f32 -0.5, %v602_v42  ;;  %v167_v52 = vand.u32 2147483647, %v602_v42 }
  0xa9   :  { %v154_v46 = vmul.f32 0.6931472, %v604_v43 }
  0xaa   :  { %605 = vlog2.f32 %v161_v44  ;;  %v165_v50 = vadd.f32 1.0, %v164_v45  ;;  %vm168_vm5 = vcmp.lt.f32.partialorder %v167_v52, 0.0004427343 }
  0xab   :  { %v160_v49 = vsel %vm159_vm3, %v157_v47, %v154_v46  ;;  %v81_v47 = vld [vmem:[#allocation4 + $0xa0] sm:$0xff] }
  0xac   :  { %v170_v51 = vadd.f32 %v160_v49, %v138_v48  ;;  %v166_v55 = vmul.f32 %v602_v42, %v165_v50  ;;  %v80_v48 = vld [vmem:[#allocation4 + $0x98] sm:$0xff]  ;;  %v79_v49 = vld [vmem:[#allocation4 + $0x90] sm:$0xff] }
  0xad   :  { %v597_v50 = vld [vmem:[#allocation6 + $0x1] ss:$0 sm:$0xff] }
  0xae   :  { %v172_v53 = vsel %vm140_vm4, %v544_v23, %v170_v51 }
  0xaf   :  { %v174_v54 = vadd.f32 -5.0, %v172_v53 }
  0xb0   :  { %v606_v56 = vpop.eup %605 }
  0xb1   :  { %v773_v57 = vsub.f32 5.0, %v174_v54  ;;  %v163_v59 = vmul.f32 0.6931472, %v606_v56 }
  0xb3   :  { %v184_v61 = vand.u32 2147483647, %v773_v57  ;;  %v169_v62 = vsel %vm168_vm5, %v166_v55, %v163_v59  ;;  %v178_v29 = vmax.f32 %v773_v57, 0.0  ;;  %vm180_vm8 = vcmp.ne.f32.partialorder %v773_v57, %v773_v57  ;;  %v598_v59 = vld [vmem:[#allocation6 + $0x2] ss:$0 sm:$0xff] }
  0xb4   :  { %v171_v63 = vadd.f32 %v169_v62, %v139_v60 }
  0xb5   :  { %v186_v0 = vsub.f32 0.0, %v184_v61 }
  0xb6   :  { %v173_v1 = vsel %vm141_vm6, %v545_v31, %v171_v63  ;;  %v84_v31 = vld [vmem:[#allocation4 + $0xb8] sm:$0xff] }
  0xb7   :  { %v188_v2 = vmul.f32 1.442695, %v186_v0  ;;  %v175_v3 = vadd.f32 -5.0, %v173_v1  ;;  %295 = vmatpush.msrb.mxu0 %v84_v31  ;;  %578 = vmatpush.msra.mxu2 %v84_v31 }
  0xb9   :  { %607 = vpow2.f32 %v188_v2  ;;  %v777_v4 = vsub.f32 5.0, %v175_v3  ;;  %296 = vmatpush.msrb.mxu0 %v83_v34  ;;  %579 = vmatpush.msra.mxu2 %v83_v34 }
  0xbb   :  { %v185_v7 = vand.u32 2147483647, %v777_v4  ;;  %v179_v42 = vmax.f32 %v777_v4, 0.0  ;;  %297 = vmatpush.msrb.mxu0 %v82_v38  ;;  %580 = vmatpush.msra.mxu2 %v82_v38  ;;  %vm181_vm10 = vcmp.ne.f32.partialorder %v777_v4, %v777_v4 }
  0xbd   :  { %v187_v9 = vsub.f32 0.0, %v185_v7  ;;  %298 = vmatpush.msrb.mxu0 %v81_v47  ;;  %581 = vmatpush.msra.mxu2 %v81_v47 }
  0xbf   :  { %v608_v11 = vpop.eup %607  ;;  %v190_v12 = vmul.f32 1.442695, %v187_v9  ;;  %299 = vmatpush.msrb.mxu0 %v80_v48  ;;  %582 = vmatpush.msra.mxu2 %v80_v48 }
  0xc0   :  { %v192_v14 = vadd.f32 1.0, %v608_v11  ;;  %v195_v15 = vmul.f32 -0.5, %v608_v11  ;;  %v198_v20 = vand.u32 2147483647, %v608_v11 }
  0xc1   :  { %609 = vpow2.f32 %v190_v12  ;;  %300 = vmatpush.msrb.mxu0 %v79_v49  ;;  %583 = vmatpush.msra.mxu2 %v79_v49 }
  0xc2   :  { %611 = vlog2.f32 %v192_v14  ;;  %v196_v18 = vadd.f32 1.0, %v195_v15  ;;  %vm199_vm7 = vcmp.lt.f32.partialorder %v198_v20, 0.0004427343 }
  0xc4   :  { %v197_v26 = vmul.f32 %v608_v11, %v196_v18 }
  0xc7   :  { %v610_v21 = vpop.eup %609 }
  0xc8   :  { %v612_v23 = vpop.eup %611  ;;  %v201_v24 = vadd.f32 1.0, %v610_v21  ;;  %v204_v27 = vmul.f32 -0.5, %v610_v21  ;;  %v207_v36 = vand.u32 2147483647, %v610_v21 }
  0xc9   :  { %v194_v25 = vmul.f32 0.6931472, %v612_v23 }
  0xca   :  { %613 = vlog2.f32 %v201_v24  ;;  %v205_v33 = vadd.f32 1.0, %v204_v27  ;;  %vm208_vm9 = vcmp.lt.f32.partialorder %v207_v36, 0.0004427343 }
  0xcb   :  { %v200_v30 = vsel %vm199_vm7, %v197_v26, %v194_v25 }
  0xcc   :  { %v210_v32 = vadd.f32 %v200_v30, %v178_v29  ;;  %v206_v41 = vmul.f32 %v610_v21, %v205_v33 }
  0xce   :  { %v212_v35 = vsel %vm180_vm8, %v773_v57, %v210_v32 }
  0xcf   :  { %v214_v37 = vsub.f32 5.0, %v212_v35 }
  0xd0   :  { %v614_v39 = vpop.eup %613 }
  0xd1   :  { %470 = vrot.lane.b32.xlu0 %v214_v37, %s737_s2  ;;  %v203_v40 = vmul.f32 0.6931472, %v614_v39 }
  0xd3   :  { %v209_v43 = vsel %vm208_vm9, %v206_v41, %v203_v40 }
  0xd4   :  { %v211_v44 = vadd.f32 %v209_v43, %v179_v42 }
  0xd6   :  { %v213_v45 = vsel %vm181_vm10, %v777_v4, %v211_v44 }
  0xd7   :  { %v215_v46 = vsub.f32 5.0, %v213_v45 }
  0xd9   :  { %472 = vrot.lane.b32.xlu0 %v215_v46, %s737_s2 }
 0x111   :  { %v234_v51 = vpop.f32.mrf.mxu1 }
 0x112   :  { %v788_v52 = vadd.f32 %v597_v50, %v234_v51 }
 0x114   :  { %vm240_vm11 = vcmp.ge.f32.partialorder %v788_v52, 0.0  ;;  %v242_v53 = vmul.f32 0.01, %v788_v52  ;;  %v546_v41 = vmul.f32 -1.442695, %v788_v52 }
 0x116   :  { %v244_v54 = vsel %vm240_vm11, %v788_v52, %v242_v53 }
 0x117   :  { %301 = vmatmul.f32.vlgmr.msrb.gmra.mxu0 %v244_v54 }
 0x11f   :  { %v237_v55 = vpop.f32.mrf.mxu3 }
 0x120   :  { %v238_v56 = vadd.f32 %v597_v50, %v237_v55 }
 0x122   :  { %vm241_vm12 = vcmp.ge.f32.partialorder %v238_v56, 0.0  ;;  %v243_v57 = vmul.f32 0.01, %v238_v56  ;;  %v547_v43 = vmul.f32 -1.442695, %v238_v56 }
 0x124   :  { %v245_v58 = vsel %vm241_vm12, %v238_v56, %v243_v57 }
 0x125   :  { %304 = vmatmul.f32.vlgmr.msra.gmra.mxu2 %v245_v58 }
 0x194   :  { %v302_v60 = vpop.f32.mrf.mxu0 }
 0x195   :  { %v303_v61 = vadd.f32 %v598_v59, %v302_v60 }
 0x197   :  { %v548_v62 = vadd.f32 5.0, %v303_v61  ;;  %v550_v63 = vadd.f32 -0.001, %v303_v61 }
 0x199   :  { %v316_v0 = vand.u32 2147483647, %v548_v62  ;;  %v396_v1 = vand.u32 2147483647, %v550_v63  ;;  %v310_v24 = vmax.f32 %v548_v62, 0.0  ;;  %v390_v32 = vmax.f32 %v550_v63, 0.0 }
 0x19a   :  { %vm312_vm15 = vcmp.ne.f32.partialorder %v548_v62, %v548_v62  ;;  %vm392_vm0 = vcmp.ne.f32.partialorder %v550_v63, %v550_v63 }
 0x19b   :  { %v318_v2 = vsub.f32 0.0, %v316_v0  ;;  %v398_v3 = vsub.f32 0.0, %v396_v1 }
 0x19d   :  { %v320_v4 = vmul.f32 1.442695, %v318_v2  ;;  %v400_v5 = vmul.f32 1.442695, %v398_v3 }
 0x19f   :  { %615 = vpow2.f32 %v320_v4 }
 0x1a0   :  { %617 = vpow2.f32 %v400_v5 }
 0x1a5   :  { %v616_v6 = vpop.eup %615 }
 0x1a6   :  { %v618_v7 = vpop.eup %617  ;;  %v324_v8 = vadd.f32 1.0, %v616_v6  ;;  %v327_v9 = vmul.f32 -0.5, %v616_v6  ;;  %v330_v17 = vand.u32 2147483647, %v616_v6 }
 0x1a7   :  { %v404_v10 = vadd.f32 1.0, %v618_v7  ;;  %v407_v11 = vmul.f32 -0.5, %v618_v7  ;;  %v410_v19 = vand.u32 2147483647, %v618_v7 }
 0x1a8   :  { %619 = vlog2.f32 %v324_v8  ;;  %v305_v12 = vpop.f32.mrf.mxu2  ;;  %v328_v14 = vadd.f32 1.0, %v327_v9  ;;  %vm331_vm13 = vcmp.lt.f32.partialorder %v330_v17, 0.0004427343 }
 0x1a9   :  { %621 = vlog2.f32 %v404_v10  ;;  %v306_v13 = vadd.f32 %v598_v59, %v305_v12  ;;  %v408_v18 = vadd.f32 1.0, %v407_v11  ;;  %vm411_vm14 = vcmp.lt.f32.partialorder %v410_v19, 0.0004427343 }
 0x1aa   :  { %v329_v26 = vmul.f32 %v616_v6, %v328_v14 }
 0x1ab   :  { %v793_v15 = vadd.f32 5.0, %v306_v13  ;;  %v795_v16 = vadd.f32 -0.001, %v306_v13  ;;  %v409_v29 = vmul.f32 %v618_v7, %v408_v18 }
 0x1ad   :  { %v317_v20 = vand.u32 2147483647, %v793_v15  ;;  %v397_v22 = vand.u32 2147483647, %v795_v16  ;;  %v311_v4 = vmax.f32 %v793_v15, 0.0  ;;  %v391_v10 = vmax.f32 %v795_v16, 0.0 }
 0x1ae   :  { %v620_v21 = vpop.eup %619  ;;  %vm313_vm3 = vcmp.ne.f32.partialorder %v793_v15, %v793_v15  ;;  %vm393_vm4 = vcmp.ne.f32.partialorder %v795_v16, %v795_v16 }
 0x1af   :  { %v622_v23 = vpop.eup %621  ;;  %v326_v25 = vmul.f32 0.6931472, %v620_v21  ;;  %v319_v27 = vsub.f32 0.0, %v317_v20  ;;  %v399_v30 = vsub.f32 0.0, %v397_v22 }
 0x1b0   :  { %v406_v28 = vmul.f32 0.6931472, %v622_v23 }
 0x1b1   :  { %v332_v31 = vsel %vm331_vm13, %v329_v26, %v326_v25  ;;  %v322_v33 = vmul.f32 1.442695, %v319_v27  ;;  %v402_v36 = vmul.f32 1.442695, %v399_v30 }
 0x1b2   :  { %v342_v34 = vadd.f32 %v332_v31, %v310_v24  ;;  %v412_v35 = vsel %vm411_vm14, %v409_v29, %v406_v28 }
 0x1b3   :  { %v422_v37 = vadd.f32 %v412_v35, %v390_v32  ;;  %623 = vpow2.f32 %v322_v33 }
 0x1b4   :  { %v344_v38 = vsel %vm312_vm15, %v548_v62, %v342_v34  ;;  %625 = vpow2.f32 %v402_v36 }
 0x1b5   :  { %v346_v39 = vadd.f32 -5.0, %v344_v38  ;;  %v424_v40 = vsel %vm392_vm0, %v550_v63, %v422_v37  ;;  %627 = vpow2.f32 %v546_v41 }
 0x1b6   :  { %v426_v42 = vadd.f32 0.001, %v424_v40  ;;  %629 = vpow2.f32 %v547_v43 }
 0x1b7   :  { %v800_v44 = vsub.f32 5.0, %v346_v39 }
 0x1b8   :  { %v802_v45 = vsub.f32 5.0, %v426_v42 }
 0x1b9   :  { %v624_v46 = vpop.eup %623  ;;  %v356_v47 = vand.u32 2147483647, %v800_v44  ;;  %v350_v36 = vmax.f32 %v800_v44, 0.0  ;;  %vm352_vm6 = vcmp.ne.f32.partialorder %v800_v44, %v800_v44 }
 0x1ba   :  { %v626_v48 = vpop.eup %625  ;;  %v436_v49 = vand.u32 2147483647, %v802_v45  ;;  %v333_v50 = vadd.f32 1.0, %v624_v46  ;;  %v336_v53 = vmul.f32 -0.5, %v624_v46  ;;  %v339_v57 = vand.u32 2147483647, %v624_v46 }
 0x1bb   :  { %v358_v51 = vsub.f32 0.0, %v356_v47  ;;  %v413_v54 = vadd.f32 1.0, %v626_v48  ;;  %v416_v52 = vmul.f32 -0.5, %v626_v48  ;;  %v419_v59 = vand.u32 2147483647, %v626_v48  ;;  %v628_v60 = vpop.eup %627 }
 0x1bc   :  { %631 = vlog2.f32 %v333_v50  ;;  %v438_v56 = vsub.f32 0.0, %v436_v49  ;;  %v337_v58 = vadd.f32 1.0, %v336_v53  ;;  %v630_v62 = vpop.eup %629  ;;  %vm340_vm1 = vcmp.lt.f32.partialorder %v339_v57, 0.0004427343 }
 0x1bd   :  { %v360_v55 = vmul.f32 1.442695, %v358_v51  ;;  %633 = vlog2.f32 %v413_v54  ;;  %v417_v61 = vadd.f32 1.0, %v416_v52  ;;  %vm420_vm2 = vcmp.lt.f32.partialorder %v419_v59, 0.0004427343 }
 0x1be   :  { %v440_v63 = vmul.f32 1.442695, %v438_v56  ;;  %v338_v3 = vmul.f32 %v624_v46, %v337_v58  ;;  %v807_v8 = vadd.f32 1.0, %v628_v60  ;;  %v810_v11 = vadd.f32 1.0, %v630_v62 }
 0x1bf   :  { %635 = vpow2.f32 %v360_v55  ;;  %v418_v6 = vmul.f32 %v626_v48, %v417_v61  ;;  %v738_v46 = vmov 0.0   ;;  %vm432_vm15 = vcmp.ne.f32.partialorder %v802_v45, %v802_v45 }
 0x1c0   :  { %637 = vpow2.f32 %v440_v63  ;;  %503 = vst [vmem:[%s917_s3] sm:$0xff] %v738_v46  ;;  %v265_v62 = vand.u32 2147483648, %v807_v8  ;;  %vm274_vm8 = vweird.f32 %v810_v11  ;;  %vm259_vm11 = vweird.f32 %v807_v8 }
 0x1c1   :  { %504 = vst [vmem:[%s917_s3 + $0x8] sm:$0xff] %v738_v46 }
 0x1c2   :  { %v632_v0 = vpop.eup %631 }
 0x1c3   :  { %v634_v1 = vpop.eup %633  ;;  %v335_v2 = vmul.f32 0.6931472, %v632_v0 }
 0x1c4   :  { %v415_v5 = vmul.f32 0.6931472, %v634_v1  ;;  %v280_v1 = vand.u32 2147483648, %v810_v11 }
 0x1c5   :  { %v636_v7 = vpop.eup %635  ;;  %v341_v9 = vsel %vm340_vm1, %v338_v3, %v335_v2 }
 0x1c6   :  { %v343_v12 = vadd.f32 %v341_v9, %v311_v4  ;;  %v421_v13 = vsel %vm420_vm2, %v418_v6, %v415_v5  ;;  %v364_v14 = vadd.f32 1.0, %v636_v7  ;;  %v367_v18 = vmul.f32 -0.5, %v636_v7  ;;  %v638_v23 = vpop.eup %637 }
 0x1c7   :  { %v423_v17 = vadd.f32 %v421_v13, %v391_v10  ;;  %v370_v27 = vand.u32 2147483647, %v636_v7  ;;  %v444_v30 = vadd.f32 1.0, %v638_v23  ;;  %v447_v48 = vmul.f32 -0.5, %v638_v23 }
 0x1c8   :  { %v345_v19 = vsel %vm313_vm3, %v793_v15, %v343_v12  ;;  %639 = vlog2.f32 %v364_v14  ;;  %v368_v25 = vadd.f32 1.0, %v367_v18  ;;  %v450_v56 = vand.u32 2147483647, %v638_v23 }
 0x1c9   :  { %641 = vrcp.f32 %v807_v8  ;;  %v347_v20 = vadd.f32 -5.0, %v345_v19  ;;  %v425_v21 = vsel %vm393_vm4, %v795_v16, %v423_v17  ;;  %vm371_vm5 = vcmp.lt.f32.partialorder %v370_v27, 0.0004427343 }
 0x1ca   :  { %643 = vrcp.f32 %v810_v11  ;;  %v427_v22 = vadd.f32 0.001, %v425_v21  ;;  %v369_v33 = vmul.f32 %v636_v7, %v368_v25  ;;  %v448_v53 = vadd.f32 1.0, %v447_v48 }
 0x1cb   :  { %v820_v24 = vsub.f32 5.0, %v347_v20  ;;  %645 = vlog2.f32 %v444_v30  ;;  %vm853_vm9 = vcmp.lt.f32.partialorder %v450_v56, 0.0004427343  ;;  %v430_v7 = vmax.f32 %v802_v45, 0.0 }
 0x1cc   :  { %v822_v26 = vsub.f32 5.0, %v427_v22  ;;  %v449_v63 = vmul.f32 %v638_v23, %v448_v53  ;;  %v263_v12 = vand.u32 2147483647, %v807_v8  ;;  %v266_v18 = vor.u32 1.1754944e-38, %v265_v62 }
 0x1cd   :  { %v357_v15 = vand.u32 2147483647, %v820_v24  ;;  %v278_v20 = vand.u32 2147483647, %v810_v11  ;;  %v281_v23 = vor.u32 1.1754944e-38, %v280_v1  ;;  %vm353_vm3 = vcmp.ne.f32.partialorder %v820_v24, %v820_v24 }
 0x1ce   :  { %v640_v28 = vpop.eup %639  ;;  %v437_v29 = vand.u32 2147483647, %v822_v26  ;;  %vm264_vm2 = vcmp.eq.f32.partialorder %v263_v12, 8.507059e+37  ;;  %vm433_vm4 = vcmp.ne.f32.partialorder %v822_v26, %v822_v26 }
 0x1cf   :  { %v826_v31 = vpop.eup %641  ;;  %v359_v32 = vsub.f32 0.0, %v357_v15  ;;  %v366_v16 = vmul.f32 0.6931472, %v640_v28  ;;  %v351_v15 = vmax.f32 %v820_v24, 0.0  ;;  %vm279_vm1 = vcmp.eq.f32.partialorder %v278_v20, 8.507059e+37 }
 0x1d0   :  { %v828_v34 = vpop.eup %643  ;;  %v439_v35 = vsub.f32 0.0, %v437_v29  ;;  %v255_v39 = vmul.f32 %v826_v31, %v807_v8  ;;  %vm260_vm7 = vweird.f32 %v826_v31 }
 0x1d1   :  { %v362_v37 = vmul.f32 1.442695, %v359_v32  ;;  %v372_v38 = vsel %vm371_vm5, %v369_v33, %v366_v16  ;;  %v270_v42 = vmul.f32 %v828_v34, %v810_v11  ;;  %v646_v51 = vpop.eup %645  ;;  %vm275_vm10 = vweird.f32 %v828_v34  ;;  %vm865_vm12 = vmor %vm259_vm11, %vm260_vm7 }
 0x1d2   :  { %v442_v40 = vmul.f32 1.442695, %v439_v35  ;;  %v382_v41 = vadd.f32 %v372_v38, %v350_v36  ;;  %v256_v49 = vsub.f32 1.0, %v255_v39  ;;  %v446_v59 = vmul.f32 0.6931472, %v646_v51  ;;  %vm875_vm13 = vmor %vm274_vm8, %vm275_vm10 }
 0x1d3   :  { %647 = vpow2.f32 %v362_v37  ;;  %v271_v50 = vsub.f32 1.0, %v270_v42  ;;  %v431_v11 = vmax.f32 %v822_v26, 0.0  ;;  %vm511_vm5 = vcmask 31744  }
 0x1d4   :  { %649 = vpow2.f32 %v442_v40  ;;  %v384_v43 = vsel %vm352_vm6, %v800_v44, %v382_v41  ;;  %v257_v52 = vmul.f32 %v826_v31, %v256_v49  ;;  %v452_v5 = vsel %vm853_vm9, %v449_v63, %v446_v59 }
 0x1d5   :  { %v386_v47 = vsub.f32 5.0, %v384_v43  ;;  %v272_v57 = vmul.f32 %v828_v34, %v271_v50  ;;  %v462_v21 = vadd.f32 %v452_v5, %v430_v7  ;;  %vm522_vm6 = vcmask 293920  }
 0x1d6   :  { %v258_v0 = vadd.f32 %v826_v31, %v257_v52  ;;  %vm533_vm7 = vcmask 556320  }
 0x1d7   :  { %505 = vrot.lane.b32.xlu2 %v386_v47, %s739_s5  ;;  %482 = vrot.lane.b32.xlu1 %v386_v47, %s736_s0  ;;  %v273_v3 = vadd.f32 %v828_v34, %v272_v57  ;;  %v464_v32 = vsel %vm432_vm15, %v802_v45, %v462_v21  ;;  %v495_v45 = vpop.permute.xlu2 %494 }
 0x1d8   :  { %v262_v17 = vsel %vm865_vm12, %v826_v31, %v258_v0  ;;  %v466_v38 = vsub.f32 5.0, %v464_v32 }
 0x1d9   :  { %v648_v44 = vpop.eup %647  ;;  %v277_v8 = vsel %vm875_vm13, %v828_v34, %v273_v3  ;;  %v267_v35 = vsel %vm264_vm2, %v266_v18, %v262_v17 }
 0x1da   :  { %v650_v54 = vpop.eup %649  ;;  %v373_v55 = vadd.f32 1.0, %v648_v44  ;;  %v376_v58 = vmul.f32 -0.5, %v648_v44  ;;  %v379_v6 = vand.u32 2147483647, %v648_v44  ;;  %v282_v33 = vsel %vm279_vm1, %v281_v23, %v277_v8 }
 0x1db   :  { %v453_v60 = vadd.f32 1.0, %v650_v54  ;;  %v456_v61 = vmul.f32 -0.5, %v650_v54  ;;  %v459_v13 = vand.u32 2147483647, %v650_v54  ;;  %v479_v40 = vsub.f32 1.0, %v282_v33 }
 0x1dc   :  { %651 = vlog2.f32 %v373_v55  ;;  %v377_v4 = vadd.f32 1.0, %v376_v58  ;;  %vm380_vm14 = vcmp.lt.f32.partialorder %v379_v6, 0.0004427343  ;;  %v478_v42 = vsub.f32 1.0, %v267_v35 }
 0x1dd   :  { %653 = vlog2.f32 %v453_v60  ;;  %v457_v9 = vadd.f32 1.0, %v456_v61  ;;  %vm460_vm0 = vcmp.lt.f32.partialorder %v459_v13, 0.0004427343  ;;  %v498_v43 = vmul.f32 %v495_v45, %v282_v33 }
 0x1de   :  { %v378_v27 = vmul.f32 %v648_v44, %v377_v4  ;;  %v499_v47 = vmul.f32 %v478_v42, %v466_v38 }
 0x1df   :  { %v458_v29 = vmul.f32 %v650_v54, %v457_v9 }
 0x1e2   :  { %v652_v14 = vpop.eup %651 }
 0x1e3   :  { %v654_v22 = vpop.eup %653  ;;  %v375_v25 = vmul.f32 0.6931472, %v652_v14 }
 0x1e4   :  { %v455_v28 = vmul.f32 0.6931472, %v654_v22 }
 0x1e5   :  { %v381_v30 = vsel %vm380_vm14, %v378_v27, %v375_v25 }
 0x1e6   :  { %v383_v31 = vadd.f32 %v381_v30, %v351_v15  ;;  %v461_v16 = vsel %vm460_vm0, %v458_v29, %v455_v28 }
 0x1e7   :  { %v463_v34 = vadd.f32 %v461_v16, %v431_v11 }
 0x1e8   :  { %v385_v36 = vsel %vm353_vm3, %v820_v24, %v383_v31  ;;  %v497_v24 = vmul.f32 %v495_v45, %v267_v35 }
 0x1e9   :  { %v387_v37 = vsub.f32 5.0, %v385_v36  ;;  %v465_v39 = vsel %vm433_vm4, %v822_v26, %v463_v34  ;;  %v471_v26 = vpop.permute.xlu0 %470 }
 0x1ea   :  { %v467_v41 = vsub.f32 5.0, %v465_v39  ;;  %v501_v49 = vadd.f32 %v499_v47, %v497_v24  ;;  %v476_v44 = vmul.f32 %v471_v26, %v267_v35 }
 0x1eb   :  { %507 = vrot.lane.b32.xlu0 %v387_v37, %s739_s5  ;;  %484 = vrot.lane.b32.xlu1 %v387_v37, %s736_s0 }
 0x1ec   :  { %v500_v46 = vmul.f32 %v479_v40, %v467_v41 }
 0x1ee   :  { %v502_v48 = vadd.f32 %v500_v46, %v498_v43 }
 0x1f1   :  { %v473_v52 = vpop.permute.xlu0 %472 }
 0x1f2   :  { %v477_v57 = vmul.f32 %v473_v52, %v282_v33 }
 0x1f3   :  { %527 = vrot.lane.b32.xlu0 %v501_v49, %s740_s6 }
 0x231   :  { %v506_v50 = vpop.permute.xlu2 %505 }
 0x232   :  { %512 = vst.msk [vmem:[%s917_s3] sm:$0xff] %vm511_vm5, %v506_v50 }
 0x249   :  { %v483_v51 = vpop.permute.xlu1 %482 }
 0x24a   :  { %v488_v53 = vmul.f32 %v483_v51, %v478_v42 }
 0x24c   :  { %v490_v54 = vadd.f32 %v488_v53, %v476_v44 }
 0x24e   :  { %516 = vrot.lane.b32.xlu1 %v490_v54, %s741_s9 }
 0x256   :  { %529 = vrot.lane.b32.xlu1 %v502_v48, %s740_s6 }
 0x25d   :  { %v508_v55 = vpop.permute.xlu0 %507  ;;  %v485_v56 = vpop.permute.xlu1 %484 }
 0x25e   :  { %513 = vst.msk [vmem:[%s917_s3 + $0x8] sm:$0xff] %vm511_vm5, %v508_v55  ;;  %v489_v58 = vmul.f32 %v485_v56, %v479_v40 }
 0x260   :  { %v491_v59 = vadd.f32 %v489_v58, %v477_v57 }
 0x262   :  { %518 = vrot.lane.b32.xlu2 %v491_v59, %s741_s9 }
 0x265   :  { %v528_v62 = vpop.permute.xlu0 %527 }
 0x2bc   :  { %v519_v60 = vpop.permute.xlu2 %518 }
 0x2bd   :  { %524 = vst.msk [vmem:[%s917_s3 + $0x8] sm:$0xff] %vm522_vm6, %v519_v60 }
 0x2c0   :  { %v517_v61 = vpop.permute.xlu1 %516 }
 0x2c1   :  { %523 = vst.msk [vmem:[%s917_s3] sm:$0xff] %vm522_vm6, %v517_v61 }
 0x2c2   :  { %534 = vst.msk [vmem:[%s917_s3] sm:$0xff] %vm533_vm7, %v528_v62 }
 0x2c8   :  { %v530_v63 = vpop.permute.xlu1 %529 }
 0x2c9   :  { %535 = vst.msk [vmem:[%s917_s3 + $0x8] sm:$0xff] %vm533_vm7, %v530_v63 }
 0x2ca   :  { %540 = vsyncpa [#allocation3], 1 }
 0x2cb   :  { %541 = vsyncpa [#allocation5], 1 }

</bundles_post_ra>
